<compile_context>
chip_gen: v5e
topology: v5e:2x2
jax: 0.10.0
libtpu: 0.0.40
codegen_flags: <defaults>
</compile_context>

<pallas_src>
import functools

import jax
import jax.numpy as jnp
from jax.experimental import pallas as pl
from jax.experimental.pallas import tpu as pltpu


def _round_up(v, m):
    return ((v + m - 1) // m) * m


def _vmem_estimate(bb, bhc, I, Hp, act_bytes, w_bytes, out_bytes, dup_hx):
    """Rough per-step VMEM footprint (activations 2x-buffered, weights 1x)."""
    lhs = 2 * bb * (I + Hp) * act_bytes + 2 * bb * 4          # x, hx, attn
    if dup_hx:
        lhs += 2 * bb * bhc * act_bytes                        # narrow hx block
    wts = (I + Hp) * 2 * bhc * w_bytes + 3 * bhc * 4           # single-buffered
    out = 2 * bb * bhc * out_bytes
    inter = 8 * bb * bhc * 4                                   # gate temporaries (f32)
    return lhs + wts + out + inter


def _agru_cell_kernel(*refs, has_hx_block):
    """One (hidden-column block j, batch tile i) grid step.

    refs (has_hx_block=False): x, hx, attn, wx, wh, bias, hy
    refs (has_hx_block=True):  x, hx, hx_block, attn, wx, wh, bias, hy

    x        : [TB, I]        input tile (already in weight dtype)
    hx       : [TB, Hp]       full hidden-state tile (contraction operand)
    hx_block : [TB, TH]       hx columns of this output block (nh > 1 only)
    attn     : [TB, 1]        attention scores (f32)
    wx       : [I,  2*TH]     x2h weights for this column block, layout [r | n]
    wh       : [Hp, 2*TH]     h2h weights for this column block, layout [r | n]
    bias     : [1,  3*TH]     [bx_r + bh_r | bx_n | bh_n]  (f32)
    hy       : [TB, TH]       output block
    """
    if has_hx_block:
        x_ref, hx_ref, hxc_ref, attn_ref, wx_ref, wh_ref, b_ref, hy_ref = refs
    else:
        x_ref, hx_ref, attn_ref, wx_ref, wh_ref, b_ref, hy_ref = refs
        hxc_ref = None

    th = hy_ref.shape[1]

    # Two MXU dots with f32 accumulation.  Operands were pre-cast in the
    # wrapper, so there is no per-step VPU cast here.
    hx_full = hx_ref[...]
    gx = jnp.dot(x_ref[...], wx_ref[...], preferred_element_type=jnp.float32)
    gh = jnp.dot(hx_full, wh_ref[...], preferred_element_type=jnp.float32)

    # Lane-aligned gate slices (th is a multiple of 128): [0:th]=reset, [th:]=new.
    b_r = b_ref[:, :th]
    b_xn = b_ref[:, th:2 * th]
    b_hn = b_ref[:, 2 * th:]

    reset_gate = jax.nn.sigmoid(gx[:, :th] + gh[:, :th] + b_r)
    new_gate = jnp.tanh(gx[:, th:] + b_xn + reset_gate * (gh[:, th:] + b_hn))

    # nh == 1: the output block IS the full hidden width -> reuse hx_full.
    hx_blk = (hxc_ref[...] if has_hx_block else hx_full).astype(jnp.float32)
    attn = attn_ref[...].astype(jnp.float32)                   # [TB, 1] broadcasts
    hy_ref[...] = (hx_blk + attn * (new_gate - hx_blk)).astype(hy_ref.dtype)


def agru_cell(x, hx, attn, wx, bx, wh, bh, *, block_b=512, block_h=None,
              weight_dtype=None, vmem_limit_bytes=None):
    """AGRU cell forward.

    x  : [B, I]    hx : [B, H]    attn : [B] or [B, 1]
    wx : [I, 3H] (= x2h.weight.T)   bx : [3H]
    wh : [H, 3H] (= h2h.weight.T)   bh : [3H]
    Gate order along the 3H axis is (u, r, n), matching torch chunk(3, 1).
    weight_dtype: optional storage/MXU dtype for weights AND activations
      (e.g. jnp.bfloat16).  Gate math / accumulation stays f32.
    Returns hy: [B, H] in x.dtype.
    """
    B, I = x.shape
    _, H = hx.shape
    out_dtype = x.dtype

    compute_dtype = (jnp.dtype(weight_dtype) if weight_dtype is not None
                     else jnp.promote_types(x.dtype, wx.dtype))
    act_bytes = jnp.dtype(compute_dtype).itemsize
    w_elem_bytes = act_bytes
    out_bytes = jnp.dtype(out_dtype).itemsize

    Hp = _round_up(H, 128)

    # ---- VMEM budget (per-generation) ---------------------------------------
    if vmem_limit_bytes is None:
        try:
            cap = pltpu.get_tpu_info().vmem_capacity_bytes
        except Exception:
            cap = 64 * 1024 * 1024          # assume the smallest (v7x) if unknown
        # ~48 MiB on 64 MiB/TC chips (v7x), ~96 MiB on 128 MiB chips (v5e/v6e).
        vmem_limit_bytes = min((cap * 3) // 4, 100 * 1024 * 1024)
    vmem_limit_bytes = int(vmem_limit_bytes)
    budget = int(vmem_limit_bytes * 0.85)   # headroom for compiler scratch

    # ---- hidden-column tile --------------------------------------------------
    # Prefer nh == 1 (full weight slab resident -> hx streamed from HBM once);
    # shrink only if the single-buffered weight block would not fit, and never
    # below 256 (MXU N starvation) unless Hp itself is smaller.
    if block_h is not None:
        bh_sel = max(128, (min(block_h, Hp) // 128) * 128)
        while Hp % bh_sel:
            bh_sel -= 128
    else:
        bh_sel = 128
        for cand in range(Hp, 127, -128):
            if Hp % cand:
                continue
            w_blk_bytes = (I + Hp) * 2 * cand * w_elem_bytes + 3 * cand * 4
            if w_blk_bytes <= budget // 2 or cand <= 256:
                bh_sel = cand
                break
    nh = Hp // bh_sel

    # ---- batch tile ----------------------------------------------------------
    bb_sel = min(_round_up(B, 8), max(8, (block_b // 8) * 8))
    while bb_sel > 8 and _vmem_estimate(bb_sel, bh_sel, I, Hp, act_bytes,
                                        w_elem_bytes, out_bytes, nh > 1) > budget:
        bb_sel = max(8, ((bb_sel // 2) // 8) * 8)

    Bp = _round_up(B, bb_sel)               # no partial edge tile
    nb = Bp // bb_sel
    pad_b = Bp - B
    pad_h = Hp - H

    # ---- pad + pre-cast activations (no per-step cast inside the kernel) ----
    xp = jnp.pad(x, ((0, pad_b), (0, 0))).astype(compute_dtype)
    hxp = jnp.pad(hx, ((0, pad_b), (0, pad_h))).astype(compute_dtype)
    attnp = jnp.pad(attn.reshape(-1, 1).astype(jnp.float32), ((0, pad_b), (0, 0)))

    # ---- drop the unused u-gate, pad, re-pack columns per block -------------
    # NOTE: in a real model this packing is done once at parameter-load time.
    def pack_w(w, k_pad):
        w_r = jnp.pad(w[:, H:2 * H], ((0, k_pad), (0, pad_h)))
        w_n = jnp.pad(w[:, 2 * H:3 * H], ((0, k_pad), (0, pad_h)))
        k = w_r.shape[0]
        stacked = jnp.stack([w_r.reshape(k, nh, bh_sel),
                             w_n.reshape(k, nh, bh_sel)], axis=2)
        return stacked.reshape(k, nh * 2 * bh_sel).astype(compute_dtype)

    wxg = pack_w(wx, 0)          # [I,  nh*2*bh]
    whg = pack_w(wh, pad_h)      # [Hp, nh*2*bh]

    # Biases: fold bh_r into bx_r (legal for the reset half only); one operand.
    b_r = jnp.pad(bx[H:2 * H] + bh[H:2 * H], (0, pad_h))
    b_xn = jnp.pad(bx[2 * H:3 * H], (0, pad_h))
    b_hn = jnp.pad(bh[2 * H:3 * H], (0, pad_h))
    bg = jnp.stack([b_r.reshape(nh, bh_sel),
                    b_xn.reshape(nh, bh_sel),
                    b_hn.reshape(nh, bh_sel)], axis=1)          # [nh, 3, bh]
    bg = bg.reshape(1, nh * 3 * bh_sel).astype(jnp.float32)

    # ---- specs ---------------------------------------------------------------
    # Column blocks on the OUTER grid axis: single-buffered weight blocks are
    # fetched once per j and stay resident across all batch tiles.
    in_specs = [
        pl.BlockSpec((bb_sel, I), lambda j, i: (i, 0)),                 # x
        pl.BlockSpec((bb_sel, Hp), lambda j, i: (i, 0)),                # hx (full)
    ]
    operands = [xp, hxp]
    if nh > 1:
        # Narrow per-block hx columns (avoids dynamic lane-dim slicing).
        in_specs.append(pl.BlockSpec((bb_sel, bh_sel), lambda j, i: (i, j)))
        operands.append(hxp)
    in_specs += [
        pl.BlockSpec((bb_sel, 1), lambda j, i: (i, 0)),                 # attn
        pl.BlockSpec((I, 2 * bh_sel), lambda j, i: (0, j),
                     pipeline_mode=pl.Buffered(1)),                     # wx [r|n]
        pl.BlockSpec((Hp, 2 * bh_sel), lambda j, i: (0, j),
                     pipeline_mode=pl.Buffered(1)),                     # wh [r|n]
        pl.BlockSpec((1, 3 * bh_sel), lambda j, i: (0, j),
                     pipeline_mode=pl.Buffered(1)),                     # bias
    ]
    operands += [attnp, wxg, whg, bg]

    kernel = functools.partial(_agru_cell_kernel, has_hx_block=(nh > 1))

    out = pl.pallas_call(
        kernel,
        out_shape=jax.ShapeDtypeStruct((Bp, Hp), out_dtype),
        grid_spec=pltpu.PrefetchScalarGridSpec(
            num_scalar_prefetch=0,
            grid=(nh, nb),
            in_specs=in_specs,
            out_specs=pl.BlockSpec((bb_sel, bh_sel), lambda j, i: (i, j)),
        ),
        compiler_params=pltpu.CompilerParams(
            dimension_semantics=("parallel", "parallel"),
            vmem_limit_bytes=vmem_limit_bytes,
        ),
    )(*operands)

    return out[:B, :H]


def agru_cell_ref(x, hx, attn, wx, bx, wh, bh):
    """Pure-JAX reference mirroring the PyTorch forward."""
    H = hx.shape[1]
    gate_x = x @ wx + bx
    gate_h = hx @ wh + bh
    i_r, i_n = gate_x[:, H:2 * H], gate_x[:, 2 * H:]
    h_r, h_n = gate_h[:, H:2 * H], gate_h[:, 2 * H:]
    reset_gate = jax.nn.sigmoid(i_r + h_r)
    new_gate = jnp.tanh(i_n + reset_gate * h_n)
    return hx + attn.reshape(-1, 1) * (new_gate - hx)


if __name__ == "__main__":
    # ---- small demo matching the module (batch=8, input=16, hidden=32) -----
    B, I, H = 8, 16, 32
    key = jax.random.PRNGKey(0)
    kx, kh, ka, kwx, kbx, kwh, kbh = jax.random.split(key, 7)

    x = jax.random.normal(kx, (B, I), dtype=jnp.float32)
    hx = jax.random.normal(kh, (B, H), dtype=jnp.float32)
    attn = jax.random.uniform(ka, (B,), dtype=jnp.float32)

    bound_x = 1.0 / jnp.sqrt(jnp.float32(I))
    bound_h = 1.0 / jnp.sqrt(jnp.float32(H))
    # Stored pre-transposed: wx = x2h.weight.T -> [I, 3H], wh = h2h.weight.T -> [H, 3H]
    wx = jax.random.uniform(kwx, (I, 3 * H), minval=-bound_x, maxval=bound_x,
                            dtype=jnp.float32)
    bx = jax.random.uniform(kbx, (3 * H,), minval=-bound_x, maxval=bound_x,
                            dtype=jnp.float32)
    wh = jax.random.uniform(kwh, (H, 3 * H), minval=-bound_h, maxval=bound_h,
                            dtype=jnp.float32)
    bh = jax.random.uniform(kbh, (3 * H,), minval=-bound_h, maxval=bound_h,
                            dtype=jnp.float32)

    hy_ref_out = agru_cell_ref(x, hx, attn, wx, bx, wh, bh)

    # f32 weights, nh == 1 path (no duplicate hx operand).
    hy = jax.block_until_ready(agru_cell(x, hx, attn, wx, bx, wh, bh))
    assert hy.shape == (B, H)
    assert jnp.allclose(hy, hy_ref_out, atol=1e-5, rtol=1e-5), "f32 mismatch"

    # bf16 weights + activations (f32 accumulation / gate math): looser tol.
    hy_bf16 = jax.block_until_ready(
        agru_cell(x, hx, attn, wx, bx, wh, bh, weight_dtype=jnp.bfloat16))
    assert jnp.allclose(hy_bf16, hy_ref_out, atol=5e-2, rtol=5e-2), "bf16 mismatch"

    # Multi-tile grid: batch padded up to block_b (B % block_b != 0) and
    # hidden-column tiling nh > 1 (exercises the narrow hx-block operand path).
    B2, I2, H2 = 37, 24, 160
    k2 = jax.random.split(jax.random.PRNGKey(1), 7)
    x2 = jax.random.normal(k2[0], (B2, I2), dtype=jnp.float32)
    hx2 = jax.random.normal(k2[1], (B2, H2), dtype=jnp.float32)
    attn2 = jax.random.uniform(k2[2], (B2,), dtype=jnp.float32)
    wx2 = jax.random.uniform(k2[3], (I2, 3 * H2), minval=-0.2, maxval=0.2,
                             dtype=jnp.float32)
    bx2 = jax.random.uniform(k2[4], (3 * H2,), minval=-0.2, maxval=0.2,
                             dtype=jnp.float32)
    wh2 = jax.random.uniform(k2[5], (H2, 3 * H2), minval=-0.2, maxval=0.2,
                             dtype=jnp.float32)
    bh2 = jax.random.uniform(k2[6], (3 * H2,), minval=-0.2, maxval=0.2,
                             dtype=jnp.float32)

    hy2 = jax.block_until_ready(
        agru_cell(x2, hx2, attn2, wx2, bx2, wh2, bh2, block_b=16, block_h=128))
    hy2_ref = agru_cell_ref(x2, hx2, attn2, wx2, bx2, wh2, bh2)
    assert hy2.shape == (B2, H2)
    assert jnp.allclose(hy2, hy2_ref, atol=1e-4, rtol=1e-4), "tiled mismatch"

    print("KERNEL_OK")
</pallas_src>

<mosaic_0001>
module attributes {stable_mosaic.version = 11 : i64} {
  func.func @_agru_cell_kernel(%arg0: i32, %arg1: i32, %arg2: memref<8x16xf32, #tpu.memory_space<vmem>>, %arg3: memref<8x128xf32, #tpu.memory_space<vmem>>, %arg4: memref<8x1xf32, #tpu.memory_space<vmem>>, %arg5: memref<16x256xf32, #tpu.memory_space<vmem>>, %arg6: memref<128x256xf32, #tpu.memory_space<vmem>>, %arg7: memref<1x384xf32, #tpu.memory_space<vmem>>, %arg8: memref<8x128xf32, #tpu.memory_space<vmem>>) attributes {dimension_semantics = [#tpu.dimension_semantics<parallel>, #tpu.dimension_semantics<parallel>], iteration_bounds = array<i64: 1, 1>, scalar_prefetch = 0 : i64, scratch_operands = 0 : i64, tpu.core_type = #tpu.core_type<tc>, window_params = [{transform_indices = @transform_0, window_bounds = array<i64: 8, 16>}, {transform_indices = @transform_1, window_bounds = array<i64: 8, 128>}, {transform_indices = @transform_2, window_bounds = array<i64: 8, 1>}, {pipeline_mode = #tpu.pipeline_mode<synchronous>, transform_indices = @transform_3, window_bounds = array<i64: 16, 256>}, {pipeline_mode = #tpu.pipeline_mode<synchronous>, transform_indices = @transform_4, window_bounds = array<i64: 128, 256>}, {pipeline_mode = #tpu.pipeline_mode<synchronous>, transform_indices = @transform_5, window_bounds = array<i64: 1, 384>}, {transform_indices = @transform_6, window_bounds = array<i64: 8, 128>}]} {
    %c0 = arith.constant 0 : index
    %c0_0 = arith.constant 0 : index
    %0 = vector.load %arg3[%c0, %c0_0] : memref<8x128xf32, #tpu.memory_space<vmem>>, vector<8x128xf32>
    %c0_1 = arith.constant 0 : index
    %c0_2 = arith.constant 0 : index
    %1 = vector.load %arg2[%c0_1, %c0_2] : memref<8x16xf32, #tpu.memory_space<vmem>>, vector<8x16xf32>
    %c0_3 = arith.constant 0 : index
    %c0_4 = arith.constant 0 : index
    %2 = vector.load %arg5[%c0_3, %c0_4] : memref<16x256xf32, #tpu.memory_space<vmem>>, vector<16x256xf32>
    %cst = arith.constant dense<0.000000e+00> : vector<8x256xf32>
    %3 = tpu.matmul %1, %2, %cst {dimension_numbers = #tpu.dot_dimension_numbers<[1], [0], [0], [1], [0, 0, 1, 1], [], []>} : vector<8x16xf32>, vector<16x256xf32>, vector<8x256xf32> -> vector<8x256xf32>
    %c0_5 = arith.constant 0 : index
    %c0_6 = arith.constant 0 : index
    %4 = vector.load %arg6[%c0_5, %c0_6] : memref<128x256xf32, #tpu.memory_space<vmem>>, vector<128x256xf32>
    %cst_7 = arith.constant dense<0.000000e+00> : vector<8x256xf32>
    %5 = tpu.matmul %0, %4, %cst_7 {dimension_numbers = #tpu.dot_dimension_numbers<[1], [0], [0], [1], [0, 0, 1, 1], [], []>} : vector<8x128xf32>, vector<128x256xf32>, vector<8x256xf32> -> vector<8x256xf32>
    %c0_8 = arith.constant 0 : index
    %c0_9 = arith.constant 0 : index
    %6 = vector.load %arg7[%c0_8, %c0_9] : memref<1x384xf32, #tpu.memory_space<vmem>>, vector<1x128xf32>
    %c0_10 = arith.constant 0 : index
    %c128 = arith.constant 128 : index
    %7 = vector.load %arg7[%c0_10, %c128] : memref<1x384xf32, #tpu.memory_space<vmem>>, vector<1x128xf32>
    %c0_11 = arith.constant 0 : index
    %c256 = arith.constant 256 : index
    %8 = vector.load %arg7[%c0_11, %c256] : memref<1x384xf32, #tpu.memory_space<vmem>>, vector<1x128xf32>
    %9 = vector.extract_strided_slice %3 {offsets = [0, 0], sizes = [8, 128], strides = [1, 1]} : vector<8x256xf32> to vector<8x128xf32>
    %10 = vector.extract_strided_slice %5 {offsets = [0, 0], sizes = [8, 128], strides = [1, 1]} : vector<8x256xf32> to vector<8x128xf32>
    %11 = arith.addf %9, %10 : vector<8x128xf32>
    %12 = vector.broadcast %6 : vector<1x128xf32> to vector<8x128xf32>
    %13 = arith.addf %11, %12 : vector<8x128xf32>
    %14 = arith.negf %13 : vector<8x128xf32>
    %15 = math.exp %14 : vector<8x128xf32>
    %cst_12 = arith.constant 1.000000e+00 : f32
    %16 = vector.broadcast %cst_12 : f32 to vector<8x128xf32>
    %17 = arith.addf %16, %15 : vector<8x128xf32>
    %18 = arith.divf %16, %17 : vector<8x128xf32>
    %19 = vector.extract_strided_slice %3 {offsets = [0, 128], sizes = [8, 128], strides = [1, 1]} : vector<8x256xf32> to vector<8x128xf32>
    %20 = vector.broadcast %7 : vector<1x128xf32> to vector<8x128xf32>
    %21 = arith.addf %19, %20 : vector<8x128xf32>
    %22 = vector.extract_strided_slice %5 {offsets = [0, 128], sizes = [8, 128], strides = [1, 1]} : vector<8x256xf32> to vector<8x128xf32>
    %23 = vector.broadcast %8 : vector<1x128xf32> to vector<8x128xf32>
    %24 = arith.addf %22, %23 : vector<8x128xf32>
    %25 = arith.mulf %18, %24 : vector<8x128xf32>
    %26 = arith.addf %21, %25 : vector<8x128xf32>
    %27 = math.tanh %26 : vector<8x128xf32>
    %c0_13 = arith.constant 0 : index
    %c0_14 = arith.constant 0 : index
    %28 = vector.load %arg4[%c0_13, %c0_14] : memref<8x1xf32, #tpu.memory_space<vmem>>, vector<8x1xf32>
    %29 = arith.subf %27, %0 : vector<8x128xf32>
    %30 = vector.broadcast %28 : vector<8x1xf32> to vector<8x128xf32>
    %31 = arith.mulf %30, %29 : vector<8x128xf32>
    %32 = arith.addf %0, %31 : vector<8x128xf32>
    %c0_15 = arith.constant 0 : index
    %c0_16 = arith.constant 0 : index
    %33 = vector.load %arg8[%c0_15, %c0_16] : memref<8x128xf32, #tpu.memory_space<vmem>>, vector<8x128xf32>
    tpu.vector_store %arg8[%c0_15, %c0_16], %32 {strides = array<i32>} : memref<8x128xf32, #tpu.memory_space<vmem>>, vector<8x128xf32>,
    return
  }
  func.func @transform_0(%arg0: i32, %arg1: i32) -> (i32, i32) {
    %c0_i32 = arith.constant 0 : i32
    %c0_i32_0 = arith.constant 0 : i32
    return %arg1, %c0_i32 : i32, i32
  }
  func.func @transform_1(%arg0: i32, %arg1: i32) -> (i32, i32) {
    %c0_i32 = arith.constant 0 : i32
    %c0_i32_0 = arith.constant 0 : i32
    return %arg1, %c0_i32 : i32, i32
  }
  func.func @transform_2(%arg0: i32, %arg1: i32) -> (i32, i32) {
    %c0_i32 = arith.constant 0 : i32
    %c0_i32_0 = arith.constant 0 : i32
    return %arg1, %c0_i32 : i32, i32
  }
  func.func @transform_3(%arg0: i32, %arg1: i32) -> (i32, i32) {
    %c0_i32 = arith.constant 0 : i32
    %c0_i32_0 = arith.constant 0 : i32
    return %c0_i32, %arg0 : i32, i32
  }
  func.func @transform_4(%arg0: i32, %arg1: i32) -> (i32, i32) {
    %c0_i32 = arith.constant 0 : i32
    %c0_i32_0 = arith.constant 0 : i32
    return %c0_i32, %arg0 : i32, i32
  }
  func.func @transform_5(%arg0: i32, %arg1: i32) -> (i32, i32) {
    %c0_i32 = arith.constant 0 : i32
    %c0_i32_0 = arith.constant 0 : i32
    return %c0_i32, %arg0 : i32, i32
  }
  func.func @transform_6(%arg0: i32, %arg1: i32) -> (i32, i32) {
    %c0_i32 = arith.constant 0 : i32
    return %arg1, %arg0 : i32, i32
  }
}

</mosaic_0001>

<bundles_post_ra>
// kernel: tpu_custom_call.1
= control target key start
LH: loop header
LB: loop body
LE: loop exit
PB: predicated region body
PF: predicated region fallthrough
CT: control target
= control target key end

     0   :  { %11 = vsyncpa [#allocation3], 0  ;;  %s450_s0 = inlined_call_operand.vmem [shape: f32[8,16], index: 0, kind: input, shape index: {}]   ;;  %s451_s1 = inlined_call_operand.hbm [shape: f32[8,128], index: 1, kind: input, shape index: {}]   ;;  %s452_s2 = inlined_call_operand.vmem [shape: f32[8,1], index: 2, kind: input, shape index: {}]   ;;  %s453_s3 = inlined_call_operand.hbm [shape: f32[16,256], index: 3, kind: input, shape index: {}]   ;;  %s454_s4 = inlined_call_operand.hbm [shape: f32[128,256], index: 4, kind: input, shape index: {}]   ;;  %s455_s5 = inlined_call_operand.vmem [shape: f32[1,384], index: 5, kind: input, shape index: {}]   ;;  %s456_s6 = inlined_call_operand.hbm [shape: f32[8,128], index: 6, kind: output, shape index: {}]  }
   0x1   :  { %12 = vsyncpa [#allocation6], 0  ;;  %s33_s23 = sshll.u32 %s453_s3, 4  ;;  %s34_s23 = int_to_ptr.hbm [resolvable:$true] %s33_s23 }
   0x2   :  { %13 = vsyncpa [#allocation4], 0  ;;  %s379_s24 = smov [#allocation5]   ;;  %s21_s28 = sshll.u32 %s451_s1, 4  ;;  %s22_s28 = int_to_ptr.hbm [resolvable:$true] %s21_s28 }
   0x3   :  { %s35_s25 = sshll.u32 %s379_s24, 4  ;;  %s380_s29 = smov 256   ;;  %s36_s25 = int_to_ptr.vmem [resolvable:$true] %s35_s25 }
   0x4   :  { %s381_s30 = smov 16   ;;  %s382_s7 = smov [#allocation2]  }
   0x5   :  { %41 = dma.hbm_to_vmem [thread:$0]  %s34_s23, 512, %s36_s25, [#allocation6], %s380_s29, %s380_s29, %s381_s30  }
   0x6   :  { %s23_s8 = sshll.u32 %s382_s7, 4  ;;  %s46_s11 = sshll.u32 %s454_s4, 4  ;;  %s24_s8 = int_to_ptr.vmem [resolvable:$true] %s23_s8  ;;  %s47_s11 = int_to_ptr.hbm [resolvable:$true] %s46_s11 }
   0x7   :  { %26 = dma.hbm_to_vmem [thread:$0]  %s22_s28, 128, %s24_s8, [#allocation3]  }
   0x8   :  { %s383_s3 = smov [#allocation7]  }
   0x9   :  { %s48_s12 = sshll.u32 %s383_s3, 4  ;;  %s49_s12 = int_to_ptr.vmem [resolvable:$true] %s48_s12 }
   0xa   :  { %54 = dma.hbm_to_vmem [thread:$0]  %s47_s11, 4096, %s49_s12, [#allocation6], %s380_s29, %s380_s29, %s381_s30  }
   0xb   :  { %373 = dma.done.wait [#allocation3], 128  }
   0xc   :  { %374 = vsyncadd [#allocation3], 4294967168 }
   0xd   :  { %375 = dma.done.wait [#allocation6], 4608  }
   0xe   :  { %376 = vsyncadd [#allocation6], 4294962688  ;;  %v149_v0 = vld [vmem:[#allocation7 + $0xf0] sm:$0xff]  ;;  %v147_v1 = vld [vmem:[#allocation7 + $0xe0] sm:$0xff]  ;;  %v384_v8 = vmov 0   ;;  %vm75_vm0 = vcmask 130048  }
   0xf   :  { %151 = vmatpush.msra.mxu2 %v149_v0  ;;  %v145_v2 = vld [vmem:[#allocation7 + $0xd0] sm:$0xff]  ;;  %v143_v3 = vld [vmem:[#allocation7 + $0xc0] sm:$0xff]  ;;  %v150_v4 = vld [vmem:[#allocation7 + $0xf8] sm:$0xff]  ;;  %267 = vset.pattern.permute.xlu0 %v384_v8  ;;  %s385_s19 = smov [#allocation8]   ;;  %s246_s22 = sshll.u32 %s456_s6, 4  ;;  %s247_s22 = int_to_ptr.hbm [resolvable:$true] %s246_s22 }
  0x10   :  { %v141_v5 = vld [vmem:[#allocation7 + $0xb0] sm:$0xff]  ;;  %171 = vmatpush.msra.mxu3 %v150_v4  ;;  %v148_v6 = vld [vmem:[#allocation7 + $0xe8] sm:$0xff]  ;;  %v146_v9 = vld [vmem:[#allocation7 + $0xd8] sm:$0xff]  ;;  %s244_s20 = sshll.u32 %s385_s19, 4  ;;  %s245_s20 = int_to_ptr.vmem [resolvable:$true] %s244_s20 }
  0x11   :  { %152 = vmatpush.msra.mxu2 %v147_v1  ;;  %v73_v7 = vld [vmem:[#allocation5 + $0x10] sm:$0xff]  ;;  %v71_v10 = vld [vmem:[#allocation5] sm:$0xff]  ;;  %v70_v11 = vld [vmem:[%s450_s0] sm:$0xff] }
  0x12   :  { %93 = vmatpush.msra.mxu0 %v73_v7  ;;  %v139_v12 = vld [vmem:[#allocation7 + $0xa0] sm:$0xff]  ;;  %172 = vmatpush.msra.mxu3 %v148_v6  ;;  %v144_v13 = vld [vmem:[#allocation7 + $0xc8] sm:$0xff]  ;;  %v137_v14 = vld [vmem:[#allocation7 + $0x90] sm:$0xff] }
  0x13   :  { %153 = vmatpush.msra.mxu2 %v145_v2  ;;  %v135_v15 = vld [vmem:[#allocation7 + $0x80] sm:$0xff]  ;;  %v142_v16 = vld [vmem:[#allocation7 + $0xb8] sm:$0xff]  ;;  %v140_v17 = vld [vmem:[#allocation7 + $0xa8] sm:$0xff] }
  0x14   :  { %94 = vmatpush.msra.mxu0 %v71_v10  ;;  %173 = vmatpush.msra.mxu3 %v146_v9  ;;  %v74_v18 = vld [vmem:[#allocation5 + $0x18] sm:$0xff]  ;;  %v72_v19 = vld [vmem:[#allocation5 + $0x8] sm:$0xff]  ;;  %v133_v21 = vld [vmem:[#allocation7 + $0x70] sm:$0xff] }
  0x15   :  { %154 = vmatpush.msra.mxu2 %v143_v3  ;;  %257 = vmatmul.msk.f32.vlgmr.msra.gmra.mxu0 %vm75_vm0, %v70_v11  ;;  %v229_v20 = vld [vmem:[%s452_s2] sm:$0xff]  ;;  %v131_v23 = vld [vmem:[#allocation7 + $0x60] sm:$0xff]  ;;  %v136_v24 = vld [vmem:[#allocation7 + $0x88] sm:$0xff] }
  0x16   :  { %174 = vmatpush.msra.mxu3 %v144_v13  ;;  %113 = vmatpush.msra.mxu1 %v74_v18  ;;  %v138_v22 = vld [vmem:[#allocation7 + $0x98] sm:$0xff]  ;;  %v129_v25 = vld [vmem:[#allocation7 + $0x50] sm:$0xff]  ;;  %v127_v27 = vld [vmem:[#allocation7 + $0x40] sm:$0xff] }
  0x17   :  { %155 = vmatpush.msra.mxu2 %v141_v5  ;;  %233 = vperm.xlu0 %267, %v229_v20   ;;  %v134_v26 = vld [vmem:[#allocation7 + $0x78] sm:$0xff]  ;;  %v132_v28 = vld [vmem:[#allocation7 + $0x68] sm:$0xff]  ;;  %v125_v29 = vld [vmem:[#allocation7 + $0x30] sm:$0xff] }
  0x18   :  { %175 = vmatpush.msra.mxu3 %v142_v16  ;;  %114 = vmatpush.msra.mxu1 %v72_v19  ;;  %v130_v30 = vld [vmem:[#allocation7 + $0x58] sm:$0xff]  ;;  %v123_v31 = vld [vmem:[#allocation7 + $0x20] sm:$0xff]  ;;  %v128_v32 = vld [vmem:[#allocation7 + $0x48] sm:$0xff] }
  0x19   :  { %156 = vmatpush.msra.mxu2 %v139_v12  ;;  %258 = vmatmul.msk.f32.vlgmr.msra.gmra.mxu1 %vm75_vm0, %v70_v11  ;;  %v121_v33 = vld [vmem:[#allocation7 + $0x10] sm:$0xff]  ;;  %v126_v34 = vld [vmem:[#allocation7 + $0x38] sm:$0xff]  ;;  %v119_v35 = vld [vmem:[#allocation7] sm:$0xff] }
  0x1a   :  { %176 = vmatpush.msra.mxu3 %v140_v17  ;;  %v69_v36 = vld [vmem:[#allocation2] sm:$0xff]  ;;  %v124_v37 = vld [vmem:[#allocation7 + $0x28] sm:$0xff] }
  0x1b   :  { %157 = vmatpush.msra.mxu2 %v137_v14  ;;  %v122_v38 = vld [vmem:[#allocation7 + $0x18] sm:$0xff]  ;;  %v120_v39 = vld [vmem:[#allocation7 + $0x8] sm:$0xff] }
  0x1c   :  { %177 = vmatpush.msra.mxu3 %v138_v22  ;;  %v268_v41 = vld [vmem:[%s455_s5] ss:$0 sm:$0xff]  ;;  %v269_v51 = vld [vmem:[%s455_s5 + $0x2] ss:$0 sm:$0xff]  ;;  %v270_v56 = vld [vmem:[%s455_s5 + $0x1] ss:$0 sm:$0xff] }
  0x1d   :  { %158 = vmatpush.msra.mxu2 %v135_v15 }
  0x1e   :  { %178 = vmatpush.msra.mxu3 %v136_v24 }
  0x1f   :  { %159 = vmatpush.msra.mxu2 %v133_v21 }
  0x20   :  { %179 = vmatpush.msra.mxu3 %v134_v26 }
  0x21   :  { %160 = vmatpush.msra.mxu2 %v131_v23 }
  0x22   :  { %180 = vmatpush.msra.mxu3 %v132_v28 }
  0x23   :  { %161 = vmatpush.msra.mxu2 %v129_v25 }
  0x24   :  { %181 = vmatpush.msra.mxu3 %v130_v30 }
  0x25   :  { %162 = vmatpush.msra.mxu2 %v127_v27 }
  0x26   :  { %182 = vmatpush.msra.mxu3 %v128_v32 }
  0x27   :  { %163 = vmatpush.msra.mxu2 %v125_v29 }
  0x28   :  { %183 = vmatpush.msra.mxu3 %v126_v34 }
  0x29   :  { %164 = vmatpush.msra.mxu2 %v123_v31 }
  0x2a   :  { %184 = vmatpush.msra.mxu3 %v124_v37 }
  0x2b   :  { %165 = vmatpush.msra.mxu2 %v121_v33 }
  0x2c   :  { %185 = vmatpush.msra.mxu3 %v122_v38 }
  0x2d   :  { %166 = vmatpush.msra.mxu2 %v119_v35 }
  0x2e   :  { %167 = vmatmul.f32.vlgmr.msra.gmra.mxu2 %v69_v36  ;;  %186 = vmatpush.msra.mxu3 %v120_v39 }
  0x2f   :  { %187 = vmatmul.f32.vlgmr.msra.gmra.mxu3 %v69_v36 }
  0x89   :  { %v234_v3 = vpop.permute.xlu0 %233 }
  0x92   :  { %v96_v40 = vpop.f32.mrf.mxu0 }
  0x96   :  { %v116_v57 = vpop.f32.mrf.mxu1 }
  0x97   :  { %v221_v62 = vadd.f32 %v270_v56, %v116_v57 }
  0xb1   :  { %v168_v42 = vpop.f32.mrf.mxu2 }
  0xb2   :  { %v194_v43 = vadd.f32 %v168_v42, %v96_v40  ;;  %v188_v52 = vpop.f32.mrf.mxu3 }
  0xb3   :  { %v225_v59 = vadd.f32 %v269_v51, %v188_v52 }
  0xb4   :  { %v198_v44 = vadd.f32 %v268_v41, %v194_v43 }
  0xb6   :  { %v259_v45 = vmul.f32 -1.442695, %v198_v44 }
  0xb8   :  { %271 = vpow2.f32 %v259_v45 }
  0xbe   :  { %v272_v46 = vpop.eup %271 }
  0xbf   :  { %v202_v47 = vadd.f32 1.0, %v272_v46 }
  0xc1   :  { %273 = vrcp.f32 %v202_v47  ;;  %v214_v53 = vand.u32 2147483648, %v202_v47  ;;  %v212_v55 = vand.u32 2147483647, %v202_v47  ;;  %vm208_vm2 = vweird.f32 %v202_v47 }
  0xc3   :  { %v215_v60 = vor.u32 1.1754944e-38, %v214_v53  ;;  %vm213_vm4 = vcmp.eq.f32.partialorder %v212_v55, 8.507059e+37 }
  0xc7   :  { %v274_v48 = vpop.eup %273 }
  0xc8   :  { %v204_v49 = vmul.f32 %v274_v48, %v202_v47  ;;  %vm209_vm1 = vweird.f32 %v274_v48 }
  0xc9   :  { %vm210_vm3 = vmor %vm208_vm2, %vm209_vm1 }
  0xca   :  { %v205_v50 = vsub.f32 1.0, %v204_v49 }
  0xcc   :  { %v206_v54 = vmul.f32 %v274_v48, %v205_v50 }
  0xce   :  { %v207_v58 = vadd.f32 %v274_v48, %v206_v54 }
  0xd0   :  { %v211_v61 = vsel %vm210_vm3, %v274_v48, %v207_v58 }
  0xd1   :  { %v216_v63 = vsel %vm213_vm4, %v215_v60, %v211_v61 }
  0xd2   :  { %v226_v0 = vmul.f32 %v225_v59, %v216_v63 }
  0xd4   :  { %v227_v1 = vadd.f32 %v226_v0, %v221_v62 }
  0xd6   :  { %275 = vtanh.f32 %v227_v1 }
  0xdc   :  { %v276_v2 = vpop.eup %275 }
  0xdd   :  { %v230_v4 = vsub.f32 %v276_v2, %v69_v36 }
  0xdf   :  { %v236_v5 = vmul.f32 %v234_v3, %v230_v4 }
  0xe1   :  { %v237_v6 = vadd.f32 %v236_v5, %v69_v36 }
  0xe3   :  { %238 = vst [vmem:[#allocation8] sm:$0xff] %v237_v6 }
  0xe4   :  { %249 = dma.vmem_to_hbm [thread:$0]  %s245_s20, 128, %s247_s22, [#allocation4]  }
  0xe5   :  { %377 = dma.done.wait [#allocation4], 128  }
  0xe6   :  { %378 = vsyncadd [#allocation4], 4294967168 }
  0xe7   :  { %254 = vsyncpa [#allocation3], 1 }
  0xe8   :  { %255 = vsyncpa [#allocation6], 1 }
  0xe9   :  { %256 = vsyncpa [#allocation4], 1 }

</bundles_post_ra>
